<compile_context>
chip_gen: v6e
topology: v6e:2x2x1
jax: 0.10.0
libtpu: 0.0.40
codegen_flags: <defaults>
</compile_context>

<pallas_src>
import math

import jax
import jax.numpy as jnp
from jax import lax
from jax.experimental import pallas as pl
from jax.experimental.pallas import tpu as pltpu  # noqa: F401  (single-step kernel; default VMEM placement)

# ---------------- configuration ----------------
D_MODEL = 32
N_HEADS = 4
HEAD_DIM = D_MODEL // N_HEADS
FFN_DIM = 64
SEQ_LEN = 8
BATCH = 2
LN_EPS = 1e-5
NEG_MASK = -1e30  # large finite negative: numerically -inf after softmax, but
                  # avoids NaN if a row were ever fully masked.


def _gelu_exact(x):
    # torch.nn.functional.gelu default: 0.5 * x * (1 + erf(x / sqrt(2)))
    return 0.5 * x * (1.0 + lax.erf(x * (1.0 / math.sqrt(2.0))))


def _layer_norm(x, gamma, beta):
    mu = jnp.mean(x, axis=-1, keepdims=True)
    xc = x - mu
    var = jnp.mean(xc * xc, axis=-1, keepdims=True)
    return xc * lax.rsqrt(var + LN_EPS) * gamma + beta


# ---------------- kernel ----------------
# vec_ref row layout: 0 = bo, 1 = ln1_gamma, 2 = ln1_beta, 3 = b2,
#                     4 = ln2_gamma, 5 = ln2_beta
def _make_encoder_layer_kernel(batch):
    def encoder_layer_kernel(
        x_ref,      # (N, D)    f32, N = seq_len * batch, rows ordered (s, b)
        kpad_ref,   # (1, N)    f32, 1.0 where the key position is padded
        wqkv_ref,   # (D, 3D)   bf16, [Wq*scale | Wk | Wv]
        bqkv_ref,   # (1, 3D)   f32,  [bq*scale | bk | bv]
        wo_ref,     # (D, D)    bf16, output projection (head-major rows)
        vec_ref,    # (6, D)    f32, packed bias / LayerNorm vectors (see above)
        w1_ref,     # (D, FFN)  bf16
        b1_ref,     # (1, FFN)  f32
        w2_ref,     # (FFN, D)  bf16
        out_ref,    # (N, D)    f32
    ):
        x = x_ref[...]                                  # (N, D) f32
        n = x.shape[0]

        # --- fused QKV projection: ONE (N,D)x(D,3D) bf16 MXU matmul ---
        qkv = jnp.dot(x.astype(jnp.bfloat16), wqkv_ref[...],
                      preferred_element_type=jnp.float32) + bqkv_ref[...]
        q = qkv[:, 0:D_MODEL]            # 1/sqrt(head_dim) already folded in
        k = qkv[:, D_MODEL:2 * D_MODEL]
        v = qkv[:, 2 * D_MODEL:3 * D_MODEL]

        # --- additive attention bias built on-chip from O(N) data ---
        # Flattened row index n maps to batch b = n % batch (rows ordered (s,b)).
        qb = lax.broadcasted_iota(jnp.int32, (n, n), 0) % batch
        kb = lax.broadcasted_iota(jnp.int32, (n, n), 1) % batch
        allowed = jnp.logical_and(qb == kb, kpad_ref[...] == 0.0)   # (N, N)
        bias = jnp.where(allowed, 0.0, NEG_MASK).astype(jnp.float32)

        # --- per-head scores + softmax + PV (intrinsically per-head) ---
        ctx_parts = []
        for h in range(N_HEADS):
            hs = h * HEAD_DIM
            qh = q[:, hs:hs + HEAD_DIM].astype(jnp.bfloat16)   # (N, hd)
            kh = k[:, hs:hs + HEAD_DIM].astype(jnp.bfloat16)
            vh = v[:, hs:hs + HEAD_DIM].astype(jnp.bfloat16)
            # contract last dim of both (q @ k^T) without an explicit transpose
            s = lax.dot_general(qh, kh, (((1,), (1,)), ((), ())),
                                preferred_element_type=jnp.float32) + bias
            m = jnp.max(s, axis=-1, keepdims=True)
            p = jnp.exp(s - m)
            denom = jnp.sum(p, axis=-1, keepdims=True)
            p = p * pl.reciprocal(denom, approx=True)
            ctx_parts.append(jnp.dot(p.astype(jnp.bfloat16), vh,
                                     preferred_element_type=jnp.float32))
        ctx = jnp.concatenate(ctx_parts, axis=-1)        # (N, D), head-major

        # --- head-concat fused output projection: ONE (N,D)x(D,D) matmul ---
        attn = jnp.dot(ctx.astype(jnp.bfloat16), wo_ref[...],
                       preferred_element_type=jnp.float32) + vec_ref[0:1]

        # residual + post-LN (normalize_before = False); dropout is eval-identity.
        x1 = _layer_norm(x + attn, vec_ref[1:2], vec_ref[2:3])

        # --- feed forward ---
        h1 = jnp.dot(x1.astype(jnp.bfloat16), w1_ref[...],
                     preferred_element_type=jnp.float32) + b1_ref[...]
        h1 = _gelu_exact(h1)
        h2 = jnp.dot(h1.astype(jnp.bfloat16), w2_ref[...],
                     preferred_element_type=jnp.float32) + vec_ref[3:4]
        x2 = _layer_norm(x1 + h2, vec_ref[4:5], vec_ref[5:6])

        # TODO(synk): torch's conditional inf/NaN clamp is an fp16-overflow
        # guard; for a finite-f32 layer it never fires, so it is omitted.
        out_ref[...] = x2.astype(out_ref.dtype)

    return encoder_layer_kernel


# ---------------- host-side packing (one-time layout prep on tiny weights) ----------------
def pack_params(p):
    scale = HEAD_DIM ** -0.5
    wqkv = jnp.concatenate([p["wq"] * scale, p["wk"], p["wv"]], axis=1)    # (D, 3D)
    bqkv = jnp.concatenate([p["bq"] * scale, p["bk"], p["bv"]])[None, :]   # (1, 3D)
    return {
        "wqkv": wqkv.astype(jnp.bfloat16),
        "bqkv": bqkv.astype(jnp.float32),
        "wo": p["wo"].astype(jnp.bfloat16),
        "vec": jnp.stack([p["bo"], p["ln1_g"], p["ln1_b"],
                          p["b2"], p["ln2_g"], p["ln2_b"]]),
        "w1": p["w1"].astype(jnp.bfloat16),
        "b1": p["b1"].reshape(1, FFN_DIM),
        "w2": p["w2"].astype(jnp.bfloat16),
    }


# ---------------- wrapper ----------------
@jax.jit
def encoder_layer_pallas(x_sbd, padding_mask, packed):
    """x_sbd: (seq_len, batch, d_model); padding_mask: (batch, seq_len) {0,1}."""
    S, B, D = x_sbd.shape
    N = S * B
    x2d = x_sbd.reshape(N, D)                 # free: contiguous row-major reshape

    # O(N) padded-key flag for flattened key index n: (s = n // B, b = n % B).
    row_b = jnp.arange(N, dtype=jnp.int32) % B
    row_s = jnp.arange(N, dtype=jnp.int32) // B
    key_padded = padding_mask.astype(jnp.float32)[row_b, row_s].reshape(1, N)

    out2d = pl.pallas_call(
        _make_encoder_layer_kernel(B),
        out_shape=jax.ShapeDtypeStruct((N, D), jnp.float32),
    )(
        x2d, key_padded,
        packed["wqkv"], packed["bqkv"], packed["wo"], packed["vec"],
        packed["w1"], packed["b1"], packed["w2"],
    )
    return out2d.reshape(S, B, D)             # free: contiguous row-major reshape


# ---------------- pure-JAX reference (faithful to the torch module, f32) ----------------
def encoder_layer_ref(x_sbd, padding_mask, params):
    x = jnp.transpose(x_sbd, (1, 0, 2))       # (B, S, D)
    B, S, D = x.shape
    scale = HEAD_DIM ** -0.5
    q = (x @ params["wq"] + params["bq"]) * scale
    k = x @ params["wk"] + params["bk"]
    v = x @ params["wv"] + params["bv"]
    q = q.reshape(B, S, N_HEADS, HEAD_DIM).transpose(0, 2, 1, 3)
    k = k.reshape(B, S, N_HEADS, HEAD_DIM).transpose(0, 2, 1, 3)
    v = v.reshape(B, S, N_HEADS, HEAD_DIM).transpose(0, 2, 1, 3)
    scores = jnp.einsum("bhqd,bhkd->bhqk", q, k)
    m = padding_mask.astype(bool)[:, None, None, :]
    scores = jnp.where(m, float("-inf"), scores)
    p = jax.nn.softmax(scores, axis=-1)
    attn = jnp.einsum("bhqk,bhkd->bhqd", p, v)
    attn = attn.transpose(0, 2, 1, 3).reshape(B, S, D)
    attn = attn @ params["wo"] + params["bo"]

    def ln(y, g, b):
        mu = jnp.mean(y, -1, keepdims=True)
        var = jnp.mean((y - mu) ** 2, -1, keepdims=True)
        return (y - mu) / jnp.sqrt(var + LN_EPS) * g + b

    x1 = ln(x + attn, params["ln1_g"], params["ln1_b"])
    h = _gelu_exact(x1 @ params["w1"] + params["b1"])
    x2 = ln(x1 + h @ params["w2"] + params["b2"], params["ln2_g"], params["ln2_b"])
    return jnp.transpose(x2, (1, 0, 2))


def init_params(key):
    ks = jax.random.split(key, 14)
    std = 0.02
    return {
        "wq": jax.random.normal(ks[0], (D_MODEL, D_MODEL), jnp.float32) * std,
        "wk": jax.random.normal(ks[1], (D_MODEL, D_MODEL), jnp.float32) * std,
        "wv": jax.random.normal(ks[2], (D_MODEL, D_MODEL), jnp.float32) * std,
        "wo": jax.random.normal(ks[3], (D_MODEL, D_MODEL), jnp.float32) * std,
        "bq": jax.random.normal(ks[4], (D_MODEL,), jnp.float32) * std,
        "bk": jax.random.normal(ks[5], (D_MODEL,), jnp.float32) * std,
        "bv": jax.random.normal(ks[6], (D_MODEL,), jnp.float32) * std,
        "bo": jax.random.normal(ks[7], (D_MODEL,), jnp.float32) * std,
        "ln1_g": 1.0 + jax.random.normal(ks[8], (D_MODEL,), jnp.float32) * 0.1,
        "ln1_b": jax.random.normal(ks[9], (D_MODEL,), jnp.float32) * std,
        "w1": jax.random.normal(ks[10], (D_MODEL, FFN_DIM), jnp.float32) * std,
        "b1": jax.random.normal(ks[11], (FFN_DIM,), jnp.float32) * std,
        "w2": jax.random.normal(ks[12], (FFN_DIM, D_MODEL), jnp.float32) * std,
        "b2": jax.random.normal(ks[13], (D_MODEL,), jnp.float32) * std,
        "ln2_g": jnp.ones((D_MODEL,), jnp.float32),
        "ln2_b": jnp.zeros((D_MODEL,), jnp.float32),
    }


if __name__ == "__main__":
    key = jax.random.PRNGKey(0)
    k_x, k_p = jax.random.split(key)
    # module input layout: (seq_len, batch, embed_dim)
    x = jax.random.normal(k_x, (SEQ_LEN, BATCH, D_MODEL), jnp.float32)
    # padding mask: (batch, src_len), 1 = padded (masked out of attention)
    padding_mask = jnp.zeros((BATCH, SEQ_LEN), jnp.int32)
    padding_mask = padding_mask.at[1, SEQ_LEN - 2:].set(1)

    params = init_params(k_p)
    packed = pack_params(params)

    # TODO(synk): dropout / attention-dropout are eval-mode identity here;
    # attn_weights output is None when output_attentions=False, so only x is returned.
    out = jax.block_until_ready(encoder_layer_pallas(x, padding_mask, packed))
    ref = jax.block_until_ready(encoder_layer_ref(x, padding_mask, params))

    assert out.shape == (SEQ_LEN, BATCH, D_MODEL)
    # Tolerance reflects bf16 MXU operands (f32 accumulation) and the EUP
    # approximate reciprocal in the softmax denominator; the reference is
    # full-f32.  Observed error is O(1e-3) on unit-scale LayerNorm outputs.
    assert jnp.allclose(out, ref, atol=1e-2, rtol=1e-2), "mismatch vs JAX reference"

    print("KERNEL_OK")
</pallas_src>

<mosaic_0001>
module attributes {stable_mosaic.version = 11 : i64} {
  func.func @encoder_layer_kernel(%arg0: memref<16x32xf32, #tpu.memory_space<vmem>>, %arg1: memref<1x16xf32, #tpu.memory_space<vmem>>, %arg2: memref<32x96xbf16, #tpu.memory_space<vmem>>, %arg3: memref<1x96xf32, #tpu.memory_space<vmem>>, %arg4: memref<32x32xbf16, #tpu.memory_space<vmem>>, %arg5: memref<6x32xf32, #tpu.memory_space<vmem>>, %arg6: memref<32x64xbf16, #tpu.memory_space<vmem>>, %arg7: memref<1x64xf32, #tpu.memory_space<vmem>>, %arg8: memref<64x32xbf16, #tpu.memory_space<vmem>>, %arg9: memref<16x32xf32, #tpu.memory_space<vmem>>) attributes {dimension_semantics = [], scalar_prefetch = 0 : i64, scratch_operands = 0 : i64, tpu.core_type = #tpu.core_type<tc>} {
    %c0 = arith.constant 0 : index
    %c0_0 = arith.constant 0 : index
    %0 = vector.load %arg0[%c0, %c0_0] : memref<16x32xf32, #tpu.memory_space<vmem>>, vector<16x32xf32>
    %1 = arith.truncf %0 : vector<16x32xf32> to vector<16x32xbf16>
    %c0_1 = arith.constant 0 : index
    %c0_2 = arith.constant 0 : index
    %2 = vector.load %arg2[%c0_1, %c0_2] : memref<32x96xbf16, #tpu.memory_space<vmem>>, vector<32x96xbf16>
    %cst = arith.constant dense<0.000000e+00> : vector<16x96xf32>
    %3 = tpu.matmul %1, %2, %cst {dimension_numbers = #tpu.dot_dimension_numbers<[1], [0], [0], [1], [0, 0, 1, 1], [], []>} : vector<16x32xbf16>, vector<32x96xbf16>, vector<16x96xf32> -> vector<16x96xf32>
    %c0_3 = arith.constant 0 : index
    %c0_4 = arith.constant 0 : index
    %4 = vector.load %arg3[%c0_3, %c0_4] : memref<1x96xf32, #tpu.memory_space<vmem>>, vector<1x96xf32>
    %5 = vector.broadcast %4 : vector<1x96xf32> to vector<16x96xf32>
    %6 = arith.addf %3, %5 : vector<16x96xf32>
    %7 = vector.extract_strided_slice %6 {offsets = [0, 0], sizes = [16, 32], strides = [1, 1]} : vector<16x96xf32> to vector<16x32xf32>
    %8 = vector.extract_strided_slice %6 {offsets = [0, 32], sizes = [16, 32], strides = [1, 1]} : vector<16x96xf32> to vector<16x32xf32>
    %9 = vector.extract_strided_slice %6 {offsets = [0, 64], sizes = [16, 32], strides = [1, 1]} : vector<16x96xf32> to vector<16x32xf32>
    %10 = tpu.iota {dimensions = array<i32: 0>} : vector<16x16xi32>
    %c2_i32 = arith.constant 2 : i32
    %c0_i32 = arith.constant 0 : i32
    %11 = arith.cmpi eq, %c2_i32, %c0_i32 : i32
    %c1_i32 = arith.constant 1 : i32
    %12 = arith.select %11, %c1_i32, %c2_i32 : i32
    %13 = vector.broadcast %12 : i32 to vector<16x16xi32>
    %14 = arith.remsi %10, %13 : vector<16x16xi32>
    %c0_i32_5 = arith.constant 0 : i32
    %15 = vector.broadcast %c0_i32_5 : i32 to vector<16x16xi32>
    %16 = arith.cmpi ne, %14, %15 : vector<16x16xi32>
    %c0_i32_6 = arith.constant 0 : i32
    %17 = vector.broadcast %c0_i32_6 : i32 to vector<16x16xi32>
    %18 = arith.cmpi slt, %14, %17 : vector<16x16xi32>
    %c0_i32_7 = arith.constant 0 : i32
    %19 = arith.cmpi slt, %12, %c0_i32_7 : i32
    %20 = vector.broadcast %19 : i1 to vector<16x16xi1>
    %21 = vector.broadcast %20 : vector<16x16xi1> to vector<16x16xi1>
    %22 = arith.xori %18, %21 : vector<16x16xi1>
    %23 = arith.andi %22, %16 : vector<16x16xi1>
    %24 = vector.broadcast %12 : i32 to vector<16x16xi32>
    %25 = arith.addi %14, %24 : vector<16x16xi32>
    %26 = arith.select %23, %25, %14 : vector<16x16xi1>, vector<16x16xi32>
    %27 = tpu.iota {dimensions = array<i32: 1>} : vector<16x16xi32>
    %c2_i32_8 = arith.constant 2 : i32
    %c0_i32_9 = arith.constant 0 : i32
    %28 = arith.cmpi eq, %c2_i32_8, %c0_i32_9 : i32
    %c1_i32_10 = arith.constant 1 : i32
    %29 = arith.select %28, %c1_i32_10, %c2_i32_8 : i32
    %30 = vector.broadcast %29 : i32 to vector<16x16xi32>
    %31 = arith.remsi %27, %30 : vector<16x16xi32>
    %c0_i32_11 = arith.constant 0 : i32
    %32 = vector.broadcast %c0_i32_11 : i32 to vector<16x16xi32>
    %33 = arith.cmpi ne, %31, %32 : vector<16x16xi32>
    %c0_i32_12 = arith.constant 0 : i32
    %34 = vector.broadcast %c0_i32_12 : i32 to vector<16x16xi32>
    %35 = arith.cmpi slt, %31, %34 : vector<16x16xi32>
    %c0_i32_13 = arith.constant 0 : i32
    %36 = arith.cmpi slt, %29, %c0_i32_13 : i32
    %37 = vector.broadcast %36 : i1 to vector<16x16xi1>
    %38 = vector.broadcast %37 : vector<16x16xi1> to vector<16x16xi1>
    %39 = arith.xori %35, %38 : vector<16x16xi1>
    %40 = arith.andi %39, %33 : vector<16x16xi1>
    %41 = vector.broadcast %29 : i32 to vector<16x16xi32>
    %42 = arith.addi %31, %41 : vector<16x16xi32>
    %43 = arith.select %40, %42, %31 : vector<16x16xi1>, vector<16x16xi32>
    %44 = arith.cmpi eq, %26, %43 : vector<16x16xi32>
    %c0_14 = arith.constant 0 : index
    %c0_15 = arith.constant 0 : index
    %45 = vector.load %arg1[%c0_14, %c0_15] : memref<1x16xf32, #tpu.memory_space<vmem>>, vector<1x16xf32>
    %cst_16 = arith.constant 0.000000e+00 : f32
    %46 = vector.broadcast %cst_16 : f32 to vector<1x16xf32>
    %47 = arith.cmpf oeq, %45, %46 : vector<1x16xf32>
    %48 = vector.broadcast %47 : vector<1x16xi1> to vector<16x16xi1>
    %49 = arith.andi %44, %48 : vector<16x16xi1>
    %cst_17 = arith.constant 0.000000e+00 : f32
    %cst_18 = arith.constant -1.000000e+30 : f32
    %50 = vector.broadcast %cst_17 : f32 to vector<16x16xf32>
    %51 = vector.broadcast %cst_18 : f32 to vector<16x16xf32>
    %52 = arith.select %49, %50, %51 : vector<16x16xi1>, vector<16x16xf32>
    %53 = vector.extract_strided_slice %7 {offsets = [0, 0], sizes = [16, 8], strides = [1, 1]} : vector<16x32xf32> to vector<16x8xf32>
    %54 = arith.truncf %53 : vector<16x8xf32> to vector<16x8xbf16>
    %55 = vector.extract_strided_slice %8 {offsets = [0, 0], sizes = [16, 8], strides = [1, 1]} : vector<16x32xf32> to vector<16x8xf32>
    %56 = arith.truncf %55 : vector<16x8xf32> to vector<16x8xbf16>
    %57 = vector.extract_strided_slice %9 {offsets = [0, 0], sizes = [16, 8], strides = [1, 1]} : vector<16x32xf32> to vector<16x8xf32>
    %58 = arith.truncf %57 : vector<16x8xf32> to vector<16x8xbf16>
    %cst_19 = arith.constant dense<0.000000e+00> : vector<16x16xf32>
    %59 = tpu.matmul %54, %56, %cst_19 {dimension_numbers = #tpu.dot_dimension_numbers<[1], [1], [0], [0], [0, 0, 1, 0], [], []>} : vector<16x8xbf16>, vector<16x8xbf16>, vector<16x16xf32> -> vector<16x16xf32>
    %60 = arith.addf %59, %52 : vector<16x16xf32>
    %cst_20 = arith.constant dense<0xFF800000> : vector<16xf32>
    %61 = vector.multi_reduction <maximumf>, %60, %cst_20 [1] : vector<16x16xf32> to vector<16xf32>
    %62 = vector.shape_cast %61 : vector<16xf32> to vector<16x1xf32>
    %63 = vector.broadcast %62 : vector<16x1xf32> to vector<16x16xf32>
    %64 = arith.subf %60, %63 : vector<16x16xf32>
    %65 = math.exp %64 : vector<16x16xf32>
    %cst_21 = arith.constant dense<0.000000e+00> : vector<16xf32>
    %66 = vector.multi_reduction <add>, %65, %cst_21 [1] : vector<16x16xf32> to vector<16xf32>
    %67 = vector.shape_cast %66 : vector<16xf32> to vector<16x1xf32>
    %68 = tpu.reciprocal %67 {approx = true} : vector<16x1xf32> -> vector<16x1xf32>
    %69 = vector.broadcast %68 : vector<16x1xf32> to vector<16x16xf32>
    %70 = arith.mulf %65, %69 : vector<16x16xf32>
    %71 = arith.truncf %70 : vector<16x16xf32> to vector<16x16xbf16>
    %cst_22 = arith.constant dense<0.000000e+00> : vector<16x8xf32>
    %72 = tpu.matmul %71, %58, %cst_22 {dimension_numbers = #tpu.dot_dimension_numbers<[1], [0], [0], [1], [0, 0, 1, 1], [], []>} : vector<16x16xbf16>, vector<16x8xbf16>, vector<16x8xf32> -> vector<16x8xf32>
    %73 = vector.extract_strided_slice %7 {offsets = [0, 8], sizes = [16, 8], strides = [1, 1]} : vector<16x32xf32> to vector<16x8xf32>
    %74 = arith.truncf %73 : vector<16x8xf32> to vector<16x8xbf16>
    %75 = vector.extract_strided_slice %8 {offsets = [0, 8], sizes = [16, 8], strides = [1, 1]} : vector<16x32xf32> to vector<16x8xf32>
    %76 = arith.truncf %75 : vector<16x8xf32> to vector<16x8xbf16>
    %77 = vector.extract_strided_slice %9 {offsets = [0, 8], sizes = [16, 8], strides = [1, 1]} : vector<16x32xf32> to vector<16x8xf32>
    %78 = arith.truncf %77 : vector<16x8xf32> to vector<16x8xbf16>
    %cst_23 = arith.constant dense<0.000000e+00> : vector<16x16xf32>
    %79 = tpu.matmul %74, %76, %cst_23 {dimension_numbers = #tpu.dot_dimension_numbers<[1], [1], [0], [0], [0, 0, 1, 0], [], []>} : vector<16x8xbf16>, vector<16x8xbf16>, vector<16x16xf32> -> vector<16x16xf32>
    %80 = arith.addf %79, %52 : vector<16x16xf32>
    %cst_24 = arith.constant dense<0xFF800000> : vector<16xf32>
    %81 = vector.multi_reduction <maximumf>, %80, %cst_24 [1] : vector<16x16xf32> to vector<16xf32>
    %82 = vector.shape_cast %81 : vector<16xf32> to vector<16x1xf32>
    %83 = vector.broadcast %82 : vector<16x1xf32> to vector<16x16xf32>
    %84 = arith.subf %80, %83 : vector<16x16xf32>
    %85 = math.exp %84 : vector<16x16xf32>
    %cst_25 = arith.constant dense<0.000000e+00> : vector<16xf32>
    %86 = vector.multi_reduction <add>, %85, %cst_25 [1] : vector<16x16xf32> to vector<16xf32>
    %87 = vector.shape_cast %86 : vector<16xf32> to vector<16x1xf32>
    %88 = tpu.reciprocal %87 {approx = true} : vector<16x1xf32> -> vector<16x1xf32>
    %89 = vector.broadcast %88 : vector<16x1xf32> to vector<16x16xf32>
    %90 = arith.mulf %85, %89 : vector<16x16xf32>
    %91 = arith.truncf %90 : vector<16x16xf32> to vector<16x16xbf16>
    %cst_26 = arith.constant dense<0.000000e+00> : vector<16x8xf32>
    %92 = tpu.matmul %91, %78, %cst_26 {dimension_numbers = #tpu.dot_dimension_numbers<[1], [0], [0], [1], [0, 0, 1, 1], [], []>} : vector<16x16xbf16>, vector<16x8xbf16>, vector<16x8xf32> -> vector<16x8xf32>
    %93 = vector.extract_strided_slice %7 {offsets = [0, 16], sizes = [16, 8], strides = [1, 1]} : vector<16x32xf32> to vector<16x8xf32>
    %94 = arith.truncf %93 : vector<16x8xf32> to vector<16x8xbf16>
    %95 = vector.extract_strided_slice %8 {offsets = [0, 16], sizes = [16, 8], strides = [1, 1]} : vector<16x32xf32> to vector<16x8xf32>
    %96 = arith.truncf %95 : vector<16x8xf32> to vector<16x8xbf16>
    %97 = vector.extract_strided_slice %9 {offsets = [0, 16], sizes = [16, 8], strides = [1, 1]} : vector<16x32xf32> to vector<16x8xf32>
    %98 = arith.truncf %97 : vector<16x8xf32> to vector<16x8xbf16>
    %cst_27 = arith.constant dense<0.000000e+00> : vector<16x16xf32>
    %99 = tpu.matmul %94, %96, %cst_27 {dimension_numbers = #tpu.dot_dimension_numbers<[1], [1], [0], [0], [0, 0, 1, 0], [], []>} : vector<16x8xbf16>, vector<16x8xbf16>, vector<16x16xf32> -> vector<16x16xf32>
    %100 = arith.addf %99, %52 : vector<16x16xf32>
    %cst_28 = arith.constant dense<0xFF800000> : vector<16xf32>
    %101 = vector.multi_reduction <maximumf>, %100, %cst_28 [1] : vector<16x16xf32> to vector<16xf32>
    %102 = vector.shape_cast %101 : vector<16xf32> to vector<16x1xf32>
    %103 = vector.broadcast %102 : vector<16x1xf32> to vector<16x16xf32>
    %104 = arith.subf %100, %103 : vector<16x16xf32>
    %105 = math.exp %104 : vector<16x16xf32>
    %cst_29 = arith.constant dense<0.000000e+00> : vector<16xf32>
    %106 = vector.multi_reduction <add>, %105, %cst_29 [1] : vector<16x16xf32> to vector<16xf32>
    %107 = vector.shape_cast %106 : vector<16xf32> to vector<16x1xf32>
    %108 = tpu.reciprocal %107 {approx = true} : vector<16x1xf32> -> vector<16x1xf32>
    %109 = vector.broadcast %108 : vector<16x1xf32> to vector<16x16xf32>
    %110 = arith.mulf %105, %109 : vector<16x16xf32>
    %111 = arith.truncf %110 : vector<16x16xf32> to vector<16x16xbf16>
    %cst_30 = arith.constant dense<0.000000e+00> : vector<16x8xf32>
    %112 = tpu.matmul %111, %98, %cst_30 {dimension_numbers = #tpu.dot_dimension_numbers<[1], [0], [0], [1], [0, 0, 1, 1], [], []>} : vector<16x16xbf16>, vector<16x8xbf16>, vector<16x8xf32> -> vector<16x8xf32>
    %113 = vector.extract_strided_slice %7 {offsets = [0, 24], sizes = [16, 8], strides = [1, 1]} : vector<16x32xf32> to vector<16x8xf32>
    %114 = arith.truncf %113 : vector<16x8xf32> to vector<16x8xbf16>
    %115 = vector.extract_strided_slice %8 {offsets = [0, 24], sizes = [16, 8], strides = [1, 1]} : vector<16x32xf32> to vector<16x8xf32>
    %116 = arith.truncf %115 : vector<16x8xf32> to vector<16x8xbf16>
    %117 = vector.extract_strided_slice %9 {offsets = [0, 24], sizes = [16, 8], strides = [1, 1]} : vector<16x32xf32> to vector<16x8xf32>
    %118 = arith.truncf %117 : vector<16x8xf32> to vector<16x8xbf16>
    %cst_31 = arith.constant dense<0.000000e+00> : vector<16x16xf32>
    %119 = tpu.matmul %114, %116, %cst_31 {dimension_numbers = #tpu.dot_dimension_numbers<[1], [1], [0], [0], [0, 0, 1, 0], [], []>} : vector<16x8xbf16>, vector<16x8xbf16>, vector<16x16xf32> -> vector<16x16xf32>
    %120 = arith.addf %119, %52 : vector<16x16xf32>
    %cst_32 = arith.constant dense<0xFF800000> : vector<16xf32>
    %121 = vector.multi_reduction <maximumf>, %120, %cst_32 [1] : vector<16x16xf32> to vector<16xf32>
    %122 = vector.shape_cast %121 : vector<16xf32> to vector<16x1xf32>
    %123 = vector.broadcast %122 : vector<16x1xf32> to vector<16x16xf32>
    %124 = arith.subf %120, %123 : vector<16x16xf32>
    %125 = math.exp %124 : vector<16x16xf32>
    %cst_33 = arith.constant dense<0.000000e+00> : vector<16xf32>
    %126 = vector.multi_reduction <add>, %125, %cst_33 [1] : vector<16x16xf32> to vector<16xf32>
    %127 = vector.shape_cast %126 : vector<16xf32> to vector<16x1xf32>
    %128 = tpu.reciprocal %127 {approx = true} : vector<16x1xf32> -> vector<16x1xf32>
    %129 = vector.broadcast %128 : vector<16x1xf32> to vector<16x16xf32>
    %130 = arith.mulf %125, %129 : vector<16x16xf32>
    %131 = arith.truncf %130 : vector<16x16xf32> to vector<16x16xbf16>
    %cst_34 = arith.constant dense<0.000000e+00> : vector<16x8xf32>
    %132 = tpu.matmul %131, %118, %cst_34 {dimension_numbers = #tpu.dot_dimension_numbers<[1], [0], [0], [1], [0, 0, 1, 1], [], []>} : vector<16x16xbf16>, vector<16x8xbf16>, vector<16x8xf32> -> vector<16x8xf32>
    %133 = tpu.concatenate %72, %92, %112, %132 in 1 : vector<16x8xf32>, vector<16x8xf32>, vector<16x8xf32>, vector<16x8xf32> -> vector<16x32xf32>
    %134 = arith.truncf %133 : vector<16x32xf32> to vector<16x32xbf16>
    %c0_35 = arith.constant 0 : index
    %c0_36 = arith.constant 0 : index
    %135 = vector.load %arg4[%c0_35, %c0_36] : memref<32x32xbf16, #tpu.memory_space<vmem>>, vector<32x32xbf16>
    %cst_37 = arith.constant dense<0.000000e+00> : vector<16x32xf32>
    %136 = tpu.matmul %134, %135, %cst_37 {dimension_numbers = #tpu.dot_dimension_numbers<[1], [0], [0], [1], [0, 0, 1, 1], [], []>} : vector<16x32xbf16>, vector<32x32xbf16>, vector<16x32xf32> -> vector<16x32xf32>
    %c0_38 = arith.constant 0 : index
    %c0_39 = arith.constant 0 : index
    %137 = vector.load %arg5[%c0_38, %c0_39] : memref<6x32xf32, #tpu.memory_space<vmem>>, vector<1x32xf32>
    %138 = vector.broadcast %137 : vector<1x32xf32> to vector<16x32xf32>
    %139 = arith.addf %136, %138 : vector<16x32xf32>
    %140 = arith.addf %0, %139 : vector<16x32xf32>
    %c1 = arith.constant 1 : index
    %c0_40 = arith.constant 0 : index
    %141 = vector.load %arg5[%c1, %c0_40] : memref<6x32xf32, #tpu.memory_space<vmem>>, vector<1x32xf32>
    %c2 = arith.constant 2 : index
    %c0_41 = arith.constant 0 : index
    %142 = vector.load %arg5[%c2, %c0_41] : memref<6x32xf32, #tpu.memory_space<vmem>>, vector<1x32xf32>
    %cst_42 = arith.constant dense<0.000000e+00> : vector<16xf32>
    %143 = vector.multi_reduction <add>, %140, %cst_42 [1] : vector<16x32xf32> to vector<16xf32>
    %144 = vector.shape_cast %143 : vector<16xf32> to vector<16x1xf32>
    %cst_43 = arith.constant 3.200000e+01 : f32
    %145 = vector.broadcast %cst_43 : f32 to vector<16x1xf32>
    %146 = arith.divf %144, %145 : vector<16x1xf32>
    %147 = vector.broadcast %146 : vector<16x1xf32> to vector<16x32xf32>
    %148 = arith.subf %140, %147 : vector<16x32xf32>
    %149 = arith.mulf %148, %148 : vector<16x32xf32>
    %cst_44 = arith.constant dense<0.000000e+00> : vector<16xf32>
    %150 = vector.multi_reduction <add>, %149, %cst_44 [1] : vector<16x32xf32> to vector<16xf32>
    %151 = vector.shape_cast %150 : vector<16xf32> to vector<16x1xf32>
    %cst_45 = arith.constant 3.200000e+01 : f32
    %152 = vector.broadcast %cst_45 : f32 to vector<16x1xf32>
    %153 = arith.divf %151, %152 : vector<16x1xf32>
    %cst_46 = arith.constant 9.99999974E-6 : f32
    %154 = vector.broadcast %cst_46 : f32 to vector<16x1xf32>
    %155 = arith.addf %153, %154 : vector<16x1xf32>
    %156 = math.rsqrt %155 : vector<16x1xf32>
    %157 = vector.broadcast %156 : vector<16x1xf32> to vector<16x32xf32>
    %158 = arith.mulf %148, %157 : vector<16x32xf32>
    %159 = vector.broadcast %141 : vector<1x32xf32> to vector<16x32xf32>
    %160 = arith.mulf %158, %159 : vector<16x32xf32>
    %161 = vector.broadcast %142 : vector<1x32xf32> to vector<16x32xf32>
    %162 = arith.addf %160, %161 : vector<16x32xf32>
    %163 = arith.truncf %162 : vector<16x32xf32> to vector<16x32xbf16>
    %c0_47 = arith.constant 0 : index
    %c0_48 = arith.constant 0 : index
    %164 = vector.load %arg6[%c0_47, %c0_48] : memref<32x64xbf16, #tpu.memory_space<vmem>>, vector<32x64xbf16>
    %cst_49 = arith.constant dense<0.000000e+00> : vector<16x64xf32>
    %165 = tpu.matmul %163, %164, %cst_49 {dimension_numbers = #tpu.dot_dimension_numbers<[1], [0], [0], [1], [0, 0, 1, 1], [], []>} : vector<16x32xbf16>, vector<32x64xbf16>, vector<16x64xf32> -> vector<16x64xf32>
    %c0_50 = arith.constant 0 : index
    %c0_51 = arith.constant 0 : index
    %166 = vector.load %arg7[%c0_50, %c0_51] : memref<1x64xf32, #tpu.memory_space<vmem>>, vector<1x64xf32>
    %167 = vector.broadcast %166 : vector<1x64xf32> to vector<16x64xf32>
    %168 = arith.addf %165, %167 : vector<16x64xf32>
    %cst_52 = arith.constant 5.000000e-01 : f32
    %169 = vector.broadcast %cst_52 : f32 to vector<16x64xf32>
    %170 = arith.mulf %169, %168 : vector<16x64xf32>
    %cst_53 = arith.constant 0.707106769 : f32
    %171 = vector.broadcast %cst_53 : f32 to vector<16x64xf32>
    %172 = arith.mulf %168, %171 : vector<16x64xf32>
    %173 = math.erf %172 : vector<16x64xf32>
    %cst_54 = arith.constant 1.000000e+00 : f32
    %174 = vector.broadcast %cst_54 : f32 to vector<16x64xf32>
    %175 = arith.addf %174, %173 : vector<16x64xf32>
    %176 = arith.mulf %170, %175 : vector<16x64xf32>
    %177 = arith.truncf %176 : vector<16x64xf32> to vector<16x64xbf16>
    %c0_55 = arith.constant 0 : index
    %c0_56 = arith.constant 0 : index
    %178 = vector.load %arg8[%c0_55, %c0_56] : memref<64x32xbf16, #tpu.memory_space<vmem>>, vector<64x32xbf16>
    %cst_57 = arith.constant dense<0.000000e+00> : vector<16x32xf32>
    %179 = tpu.matmul %177, %178, %cst_57 {dimension_numbers = #tpu.dot_dimension_numbers<[1], [0], [0], [1], [0, 0, 1, 1], [], []>} : vector<16x64xbf16>, vector<64x32xbf16>, vector<16x32xf32> -> vector<16x32xf32>
    %c3 = arith.constant 3 : index
    %c0_58 = arith.constant 0 : index
    %180 = vector.load %arg5[%c3, %c0_58] : memref<6x32xf32, #tpu.memory_space<vmem>>, vector<1x32xf32>
    %181 = vector.broadcast %180 : vector<1x32xf32> to vector<16x32xf32>
    %182 = arith.addf %179, %181 : vector<16x32xf32>
    %183 = arith.addf %162, %182 : vector<16x32xf32>
    %c4 = arith.constant 4 : index
    %c0_59 = arith.constant 0 : index
    %184 = vector.load %arg5[%c4, %c0_59] : memref<6x32xf32, #tpu.memory_space<vmem>>, vector<1x32xf32>
    %c5 = arith.constant 5 : index
    %c0_60 = arith.constant 0 : index
    %185 = vector.load %arg5[%c5, %c0_60] : memref<6x32xf32, #tpu.memory_space<vmem>>, vector<1x32xf32>
    %cst_61 = arith.constant dense<0.000000e+00> : vector<16xf32>
    %186 = vector.multi_reduction <add>, %183, %cst_61 [1] : vector<16x32xf32> to vector<16xf32>
    %187 = vector.shape_cast %186 : vector<16xf32> to vector<16x1xf32>
    %cst_62 = arith.constant 3.200000e+01 : f32
    %188 = vector.broadcast %cst_62 : f32 to vector<16x1xf32>
    %189 = arith.divf %187, %188 : vector<16x1xf32>
    %190 = vector.broadcast %189 : vector<16x1xf32> to vector<16x32xf32>
    %191 = arith.subf %183, %190 : vector<16x32xf32>
    %192 = arith.mulf %191, %191 : vector<16x32xf32>
    %cst_63 = arith.constant dense<0.000000e+00> : vector<16xf32>
    %193 = vector.multi_reduction <add>, %192, %cst_63 [1] : vector<16x32xf32> to vector<16xf32>
    %194 = vector.shape_cast %193 : vector<16xf32> to vector<16x1xf32>
    %cst_64 = arith.constant 3.200000e+01 : f32
    %195 = vector.broadcast %cst_64 : f32 to vector<16x1xf32>
    %196 = arith.divf %194, %195 : vector<16x1xf32>
    %cst_65 = arith.constant 9.99999974E-6 : f32
    %197 = vector.broadcast %cst_65 : f32 to vector<16x1xf32>
    %198 = arith.addf %196, %197 : vector<16x1xf32>
    %199 = math.rsqrt %198 : vector<16x1xf32>
    %200 = vector.broadcast %199 : vector<16x1xf32> to vector<16x32xf32>
    %201 = arith.mulf %191, %200 : vector<16x32xf32>
    %202 = vector.broadcast %184 : vector<1x32xf32> to vector<16x32xf32>
    %203 = arith.mulf %201, %202 : vector<16x32xf32>
    %204 = vector.broadcast %185 : vector<1x32xf32> to vector<16x32xf32>
    %205 = arith.addf %203, %204 : vector<16x32xf32>
    %c0_66 = arith.constant 0 : index
    %c0_67 = arith.constant 0 : index
    %206 = vector.load %arg9[%c0_66, %c0_67] : memref<16x32xf32, #tpu.memory_space<vmem>>, vector<16x32xf32>
    tpu.vector_store %arg9[%c0_66, %c0_67], %205 {strides = array<i32>} : memref<16x32xf32, #tpu.memory_space<vmem>>, vector<16x32xf32>,
    return
  }
}

</mosaic_0001>

<bundles_post_ra>
// kernel: encoder_layer_pallas.1
= control target key start
LH: loop header
LB: loop body
LE: loop exit
PB: predicated region body
PF: predicated region fallthrough
CT: control target
= control target key end

     0   :  { %v1262_v1 = vmov 0.0   ;;  %vm1263_vm0 = vmmov 0   ;;  %vm60_vm1 = vcmask 261120   ;;  %s1517_s0 = inlined_call_operand.vmem [shape: f32[16,32], index: 0, kind: input, shape index: {}]   ;;  %s1518_s1 = inlined_call_operand.vmem [shape: f32[1,16], index: 1, kind: input, shape index: {}]   ;;  %s1519_s2 = inlined_call_operand.vmem [shape: bf16[32,96], index: 2, kind: input, shape index: {}]   ;;  %s1520_s3 = inlined_call_operand.vmem [shape: f32[1,96], index: 3, kind: input, shape index: {}]   ;;  %s1521_s4 = inlined_call_operand.vmem [shape: bf16[32,32], index: 4, kind: input, shape index: {}]   ;;  %s1522_s5 = inlined_call_operand.vmem [shape: f32[6,32], index: 5, kind: input, shape index: {}]   ;;  %s1523_s6 = inlined_call_operand.vmem [shape: bf16[32,64], index: 6, kind: input, shape index: {}]   ;;  %s1524_s7 = inlined_call_operand.vmem [shape: f32[1,64], index: 7, kind: input, shape index: {}]   ;;  %s1525_s8 = inlined_call_operand.vmem [shape: bf16[64,32], index: 8, kind: input, shape index: {}]   ;;  %s1526_s9 = inlined_call_operand.hbm [shape: f32[16,32], index: 9, kind: output, shape index: {}]  }
   0x1   :  { %v1186_v0 = vld [vmem:[%s1519_s2 + $0x8] sm:$0xff]   ;;  %1067 = vmatprep.subr.bf16.mxu0 %v1262_v1  ;;  %1075 = vmatprep.subr.bf16.mxu1 %v1262_v1  ;;  %v1187_v2 = vld [vmem:[%s1519_s2] sm:$0xff]  }
   0x2   :  { %1068 = vmatpush3.bf16.msra.mxu0 %v1186_v0  ;;  %1071 = vmatprep.mubr.msk.bf16.mxu0 %vm1263_vm0, %v1262_v1  ;;  %v1345_v3 = vld [vmem:[%s1517_s0] sm:$0xff]  ;;  %v1350_v4 = vld [vmem:[%s1517_s0 + $0x8] sm:$0xff] }
   0x3   :  { %1069 = vmatprep.subr.bf16.mxu0 %v1262_v1  ;;  %1077 = vmatprep.mubr.msk.bf16.mxu1 %vm1263_vm0, %v1262_v1  ;;  %v36_v5 = vpack.c.bf16 %v1350_v4, %v1345_v3 }
   0x6   :  { %1070 = vmatpush3.bf16.msra.mxu0 %v1187_v2 }
   0x7   :  { %1081 = vmatprep.subr.bf16.mxu0 %v1262_v1 }
   0x8   :  { %14 = vsyncpa [#allocation3], 0  ;;  %v1007_v7 = vld [vmem:[%s1520_s3] ss:$0 sm:$0xff]  ;;  %s1264_s17 = smov 120   ;;  %s1265_s18 = smov 96   ;;  %v105_v25 = vlaneseq }
   0x9   :  { %1072 = vmatmul.mubr.msk.bf16.vlgmr.msra.gmra.mxu0 %vm60_vm1, %v36_v5  ;;  %s1266_s19 = smov 80   ;;  %s1267_s20 = smov 88   ;;  %vm164_vm2 = vcmask 64512   ;;  %v148_v26 = vld [vmem:[%s1518_s1] sm:$0x1]  ;;  %v1271_v30 = vmov 0  }
   0xa   :  { %1083 = vmatprep.mubr.msk.bf16.mxu0 %vm1263_vm0, %v1262_v1  ;;  %s1268_s3 = smov 72   ;;  %s1269_s21 = smov 112   ;;  %v106_v27 = vshrl.u32 %v105_v25, 7  ;;  %vm149_vm3 = vcmp.eq.f32.partialorder %v148_v26, 0.0  ;;  %v133_v28 = vand.u32 127, %v105_v25  ;;  %vm212_vm9 = vcmask 130048  }
   0xb   :  { %s1270_s22 = smov 104   ;;  %v150_v31 = vsel %vm149_vm3, 1, %v1271_v30  ;;  %v1272_v37 = vmov -1e+30   ;;  %s1273_s1 = smov 56   ;;  %vm674_vm10 = vcmask 195584  }
   0xc   :  { %v153_v29 = vsub.s32 0, %v106_v27  ;;  %v112_v32 = vand.u32 1, %v106_v27  ;;  %v138_v33 = vand.u32 1, %v133_v28  ;;  %v107_v35 = vadd.s32 8, %v106_v27  ;;  %s1274_s25 = smov 64   ;;  %s1275_s26 = smov 48  }
   0xd   :  { %s1276_s27 = smov 40   ;;  %s1277_s30 = smov 8   ;;  %vm902_vm11 = vcmask 523264  }
   0xe   :  { %v154_v34 = vrot.slane %v150_v31, %v153_v29  ;;  %vm146_vm4 = vcmp.eq.s32.totalorder %v112_v32, %v138_v33  ;;  %v119_v36 = vand.u32 1, %v107_v35  ;;  %s1278_s12 = smov 16   ;;  %s1279_s13 = smov 24  }
  0x10   :  { %vm155_vm5 = vcmp.eq.s32.totalorder %v154_v34, 1  ;;  %vm147_vm7 = vcmp.eq.s32.totalorder %v119_v36, %v138_v33 }
  0x11   :  { %vm156_vm6 = vmand %vm146_vm4, %vm155_vm5 }
  0x12   :  { %v158_v38 = vsel %vm156_vm6, 0.0, %v1272_v37  ;;  %vm157_vm8 = vmand %vm147_vm7, %vm155_vm5 }
  0x13   :  { %v159_v42 = vsel %vm157_vm8, 0.0, %v1272_v37 }
  0xc9   :  { %v98_v6 = vpop.f32.mrf.mxu0 }
  0xca   :  { %v99_v10 = vadd.f32 %v1007_v7, %v98_v6 }
  0xcb   :  { %v1073_v8 = vpop.f32.mrf.mxu0 }
  0xcd   :  { %v101_v9 = vpop.f32.mrf.mxu0 }
  0xce   :  { %v102_v11 = vadd.f32 %v1007_v7, %v101_v9 }
  0xcf   :  { %v1074_v12 = vpop.f32.mrf.mxu0 }
  0xd0   :  { %v1364_v13 = vpack.c.bf16 %v102_v11, %v99_v10 }
  0xd2   :  { %283 = vrot.lane.b32.xlu1 %v1364_v13, %s1264_s17  ;;  %162 = vrot.lane.b32.xlu0 %v1364_v13, %s1265_s18 }
  0xd6   :  { %406 = vrot.lane.b32.xlu1 %v1364_v13, %s1266_s19  ;;  %285 = vrot.lane.b32.xlu0 %v1364_v13, %s1267_s20 }
  0xda   :  { %527 = vrot.lane.b32.xlu1 %v1364_v13, %s1268_s3  ;;  %404 = vrot.lane.b32.xlu0 %v1364_v13, %s1269_s21 }
  0xde   :  { %525 = vrot.lane.b32.xlu0 %v1364_v13, %s1270_s22 }
 0x144   :  { %v163_v14 = vpop.permute.xlu0 %162  ;;  %v284_v17 = vpop.permute.xlu1 %283 }
 0x145   :  { %v169_v15 = vsel %vm164_vm2, %v163_v14, 0 }
 0x146   :  { %1076 = vmatpush3.bf16.xpose.msra.mxu1 %v169_v15 }
 0x147   :  { %1087 = vmatprep.subr.bf16.mxu1 %v1262_v1 }
 0x148   :  { %v286_v16 = vpop.permute.xlu0 %285  ;;  %v407_v19 = vpop.permute.xlu1 %406 }
 0x149   :  { %v291_v18 = vsel %vm164_vm2, %v286_v16, 0  ;;  %v412_v20 = vsel %vm164_vm2, %v407_v19, 0 }
 0x14c   :  { %v528_v21 = vpop.permute.xlu1 %527  ;;  %v405_v22 = vpop.permute.xlu0 %404 }
 0x14d   :  { %1078 = vmatmul.mubr.msk.bf16.vlgmr.msra.gmra.mxu1 %vm164_vm2, %v1364_v13  ;;  %v533_v23 = vsel %vm164_vm2, %v528_v21, 0 }
 0x14e   :  { %1088 = vmatpush3.bf16.xpose.msra.mxu1 %v291_v18  ;;  %1089 = vmatprep.mubr.msk.bf16.mxu1 %vm1263_vm0, %v1262_v1 }
 0x14f   :  { %1099 = vmatprep.subr.bf16.mxu1 %v1262_v1 }
 0x150   :  { %v526_v24 = vpop.permute.xlu0 %525 }
 0x155   :  { %1090 = vmatmul.mubr.msk.bf16.vlgmr.msra.gmra.mxu1 %vm164_vm2, %v284_v17 }
 0x156   :  { %1100 = vmatpush3.bf16.xpose.msra.mxu1 %v412_v20  ;;  %1101 = vmatprep.mubr.msk.bf16.mxu1 %vm1263_vm0, %v1262_v1 }
 0x157   :  { %1111 = vmatprep.subr.bf16.mxu1 %v1262_v1 }
 0x15d   :  { %1102 = vmatmul.mubr.msk.bf16.vlgmr.msra.gmra.mxu1 %vm164_vm2, %v405_v22 }
 0x15e   :  { %1112 = vmatpush3.bf16.xpose.msra.mxu1 %v533_v23  ;;  %1113 = vmatprep.mubr.msk.bf16.mxu1 %vm1263_vm0, %v1262_v1 }
 0x15f   :  { %1123 = vmatprep.subr.bf16.mxu1 %v1262_v1 }
 0x165   :  { %1114 = vmatmul.mubr.msk.bf16.vlgmr.msra.gmra.mxu1 %vm164_vm2, %v526_v24 }
 0x166   :  { %1127 = vmatprep.mubr.msk.bf16.mxu1 %vm1263_vm0, %v1262_v1 }
 0x20d   :  { %v205_v39 = vpop.f32.mrf.mxu1 }
 0x20e   :  { %v206_v40 = vadd.f32 %v205_v39, %v158_v38 }
 0x20f   :  { %v1079_v41 = vpop.f32.mrf.mxu1 }
 0x210   :  { %v213_v43 = vsel %vm212_vm9, %v206_v40, -inf }
 0x211   :  { %214 = vmax.xlane.f32.xlu1 %v213_v43  ;;  %v208_v44 = vpop.f32.mrf.mxu1 }
 0x212   :  { %v209_v45 = vadd.f32 %v208_v44, %v159_v42 }
 0x213   :  { %v1080_v46 = vpop.f32.mrf.mxu1 }
 0x214   :  { %v216_v47 = vsel %vm212_vm9, %v209_v45, -inf }
 0x215   :  { %217 = vmax.xlane.f32.xlu0 %v216_v47  ;;  %v327_v48 = vpop.f32.mrf.mxu1 }
 0x216   :  { %v328_v49 = vadd.f32 %v327_v48, %v158_v38 }
 0x217   :  { %v1091_v50 = vpop.f32.mrf.mxu1 }
 0x218   :  { %v334_v51 = vsel %vm212_vm9, %v328_v49, -inf }
 0x219   :  { %335 = vmax.xlane.f32.xlu0 %v334_v51  ;;  %v330_v52 = vpop.f32.mrf.mxu1 }
 0x21a   :  { %v331_v53 = vadd.f32 %v330_v52, %v159_v42 }
 0x21b   :  { %v1092_v54 = vpop.f32.mrf.mxu1 }
 0x21c   :  { %v337_v55 = vsel %vm212_vm9, %v331_v53, -inf }
 0x21d   :  { %338 = vmax.xlane.f32.xlu1 %v337_v55  ;;  %v448_v56 = vpop.f32.mrf.mxu1 }
 0x21e   :  { %v449_v57 = vadd.f32 %v448_v56, %v158_v38 }
 0x21f   :  { %v1103_v58 = vpop.f32.mrf.mxu1 }
 0x220   :  { %v455_v59 = vsel %vm212_vm9, %v449_v57, -inf }
 0x221   :  { %456 = vmax.xlane.f32.xlu0 %v455_v59  ;;  %v451_v60 = vpop.f32.mrf.mxu1 }
 0x222   :  { %v452_v61 = vadd.f32 %v451_v60, %v159_v42 }
 0x223   :  { %v1104_v62 = vpop.f32.mrf.mxu1 }
 0x224   :  { %v458_v63 = vsel %vm212_vm9, %v452_v61, -inf }
 0x225   :  { %459 = vmax.xlane.f32.xlu1 %v458_v63  ;;  %v569_v0 = vpop.f32.mrf.mxu1 }
 0x226   :  { %v570_v2 = vadd.f32 %v569_v0, %v158_v38 }
 0x227   :  { %v1115_v5 = vpop.f32.mrf.mxu1 }
 0x228   :  { %v576_v6 = vsel %vm212_vm9, %v570_v2, -inf }
 0x229   :  { %577 = vmax.xlane.f32.xlu0 %v576_v6  ;;  %v572_v7 = vpop.f32.mrf.mxu1 }
 0x22a   :  { %v573_v8 = vadd.f32 %v572_v7, %v159_v42 }
 0x22b   :  { %v1116_v9 = vpop.f32.mrf.mxu1 }
 0x22c   :  { %v579_v10 = vsel %vm212_vm9, %v573_v8, -inf }
 0x22d   :  { %580 = vmax.xlane.f32.xlu1 %v579_v10 }
 0x29a   :  { %v215_v11 = vpop.xlane.xlu1 %214 }
 0x29b   :  { %v219_v12 = vsub.f32 %v206_v40, %v215_v11 }
 0x29d   :  { %v221_v14 = vmul.f32 1.442695, %v219_v12 }
 0x29e   :  { %v218_v15 = vpop.xlane.xlu0 %217 }
 0x29f   :  { %1196 = vpow2.f32 %v221_v14  ;;  %v220_v16 = vsub.f32 %v209_v45, %v218_v15 }
 0x2a1   :  { %v223_v17 = vmul.f32 1.442695, %v220_v16 }
 0x2a2   :  { %v336_v18 = vpop.xlane.xlu0 %335 }
 0x2a3   :  { %1198 = vpow2.f32 %v223_v17  ;;  %v340_v19 = vsub.f32 %v328_v49, %v336_v18 }
 0x2a5   :  { %v342_v20 = vmul.f32 1.442695, %v340_v19 }
 0x2a6   :  { %v339_v27 = vpop.xlane.xlu1 %338 }
 0x2a7   :  { %1200 = vpow2.f32 %v342_v20  ;;  %v341_v28 = vsub.f32 %v331_v53, %v339_v27 }
 0x2a9   :  { %v344_v32 = vmul.f32 1.442695, %v341_v28 }
 0x2aa   :  { %v457_v29 = vpop.xlane.xlu0 %456 }
 0x2ab   :  { %v461_v31 = vsub.f32 %v449_v57, %v457_v29  ;;  %1202 = vpow2.f32 %v344_v32 }
 0x2ac   :  { %v1197_v21 = vpop.eup %1196 }
 0x2ad   :  { %v225_v22 = vsel %vm212_vm9, %v1197_v21, 0.0  ;;  %v463_v36 = vmul.f32 1.442695, %v461_v31 }
 0x2ae   :  { %226 = vadd.xlane.f32.xlu0 %v225_v22  ;;  %v460_v30 = vpop.xlane.xlu1 %459 }
 0x2af   :  { %v462_v33 = vsub.f32 %v452_v61, %v460_v30  ;;  %1204 = vpow2.f32 %v463_v36  ;;  %v1188_v30 = vld [vmem:[%s1521_s4 + $0x8] sm:$0xff]  }
 0x2b0   :  { %v1199_v23 = vpop.eup %1198  ;;  %1124 = vmatpush3.bf16.msra.mxu1 %v1188_v30 }
 0x2b1   :  { %v228_v24 = vsel %vm212_vm9, %v1199_v23, 0.0  ;;  %v465_v38 = vmul.f32 1.442695, %v462_v33  ;;  %1125 = vmatprep.subr.bf16.mxu1 %v1262_v1 }
 0x2b2   :  { %229 = vadd.xlane.f32.xlu1 %v228_v24  ;;  %v578_v34 = vpop.xlane.xlu0 %577 }
 0x2b3   :  { %v582_v37 = vsub.f32 %v570_v2, %v578_v34  ;;  %1206 = vpow2.f32 %v465_v38 }
 0x2b4   :  { %v1407_v25 = vpop.eup %1200 }
 0x2b5   :  { %v346_v26 = vsel %vm212_vm9, %v1407_v25, 0.0  ;;  %v584_v40 = vmul.f32 1.442695, %v582_v37 }
 0x2b6   :  { %347 = vadd.xlane.f32.xlu0 %v346_v26  ;;  %v581_v35 = vpop.xlane.xlu1 %580 }
 0x2b7   :  { %v583_v39 = vsub.f32 %v573_v8, %v581_v35  ;;  %1208 = vpow2.f32 %v584_v40  ;;  %v1189_v35 = vld [vmem:[%s1521_s4] sm:$0xff]  }
 0x2b8   :  { %v1203_v42 = vpop.eup %1202  ;;  %1126 = vmatpush3.bf16.msra.mxu1 %v1189_v35 }
 0x2b9   :  { %v586_v41 = vmul.f32 1.442695, %v583_v39  ;;  %v349_v44 = vsel %vm212_vm9, %v1203_v42, 0.0  ;;  %1139 = vmatprep.subr.bf16.mxu1 %v1262_v1 }
 0x2bb   :  { %1210 = vpow2.f32 %v586_v41 }
 0x2bc   :  { %v1205_v43 = vpop.eup %1204 }
 0x2bd   :  { %v467_v48 = vsel %vm212_vm9, %v1205_v43, 0.0 }
 0x2c0   :  { %v1207_v45 = vpop.eup %1206 }
 0x2c1   :  { %v470_v47 = vsel %vm212_vm9, %v1207_v45, 0.0 }
 0x2c3   :  { %357 = vrot.lane.b32.xlu1 %v1364_v13, %s1273_s1 }
 0x2c4   :  { %v1414_v46 = vpop.eup %1208 }
 0x2c5   :  { %v588_v51 = vsel %vm212_vm9, %v1414_v46, 0.0 }
 0x2c8   :  { %v1211_v49 = vpop.eup %1210 }
 0x2c9   :  { %v591_v50 = vsel %vm212_vm9, %v1211_v49, 0.0 }
 0x2cc   :  { %236 = vrot.lane.b32.xlu0 %v1364_v13, %s1274_s25 }
 0x2e7   :  { %350 = vadd.xlane.f32.xlu1 %v349_v44 }
 0x2eb   :  { %471 = vadd.xlane.f32.xlu1 %v470_v47  ;;  %468 = vadd.xlane.f32.xlu0 %v467_v48 }
 0x2ef   :  { %592 = vadd.xlane.f32.xlu1 %v591_v50  ;;  %589 = vadd.xlane.f32.xlu0 %v588_v51 }
 0x300   :  { %478 = vrot.lane.b32.xlu1 %v1364_v13, %s1275_s26 }
 0x305   :  { %599 = vrot.lane.b32.xlu0 %v1364_v13, %s1276_s27 }
 0x337   :  { %v227_v52 = vpop.xlane.xlu0 %226 }
 0x338   :  { %1212 = vrcp.f32 %v227_v52 }
 0x33b   :  { %v230_v53 = vpop.xlane.xlu1 %229 }
 0x33c   :  { %1214 = vrcp.f32 %v230_v53 }
 0x33f   :  { %v348_v54 = vpop.xlane.xlu0 %347  ;;  %v358_v61 = vpop.permute.xlu1 %357 }
 0x340   :  { %1216 = vrcp.f32 %v348_v54 }
 0x343   :  { %v237_v55 = vpop.permute.xlu0 %236 }
 0x344   :  { %1082 = vmatpush3.bf16.msra.mxu0 %v237_v55 }
 0x345   :  { %1093 = vmatprep.subr.bf16.mxu0 %v1262_v1  ;;  %v1213_v56 = vpop.eup %1212 }
 0x346   :  { %v233_v58 = vmul.f32 %v1213_v56, %v1197_v21 }
 0x349   :  { %v1215_v57 = vpop.eup %1214 }
 0x34a   :  { %v234_v59 = vmul.f32 %v1215_v57, %v1199_v23 }
 0x34c   :  { %v235_v60 = vpack.c.bf16 %v234_v59, %v233_v58 }
 0x34d   :  { %v1217_v5 = vpop.eup %1216 }
 0x34e   :  { %1084 = vmatmul.mubr.msk.bf16.vlgmr.msra.gmra.mxu0 %vm212_vm9, %v235_v60  ;;  %v354_v7 = vmul.f32 %v1217_v5, %v1407_v25  ;;  %v1019_v60 = vld [vmem:[%s1522_s5] ss:$0 sm:$0xff] }
 0x34f   :  { %1094 = vmatpush3.bf16.msra.mxu0 %v358_v61  ;;  %1095 = vmatprep.mubr.msk.bf16.mxu0 %vm1263_vm0, %v1262_v1 }
 0x350   :  { %1105 = vmatprep.subr.bf16.mxu0 %v1262_v1 }
 0x370   :  { %v351_v13 = vpop.xlane.xlu1 %350 }
 0x371   :  { %1218 = vrcp.f32 %v351_v13 }
 0x374   :  { %v472_v62 = vpop.xlane.xlu1 %471  ;;  %v469_v63 = vpop.xlane.xlu0 %468 }
 0x375   :  { %1220 = vrcp.f32 %v472_v62 }
 0x376   :  { %1222 = vrcp.f32 %v469_v63 }
 0x378   :  { %v593_v0 = vpop.xlane.xlu1 %592  ;;  %v590_v2 = vpop.xlane.xlu0 %589 }
 0x379   :  { %1224 = vrcp.f32 %v593_v0 }
 0x37a   :  { %1226 = vrcp.f32 %v590_v2 }
 0x37c   :  { %v479_v12 = vpop.permute.xlu1 %478  ;;  %v600_v19 = vpop.permute.xlu0 %599 }
 0x37e   :  { %v1219_v6 = vpop.eup %1218 }
 0x37f   :  { %v355_v8 = vmul.f32 %v1219_v6, %v1203_v42 }
 0x381   :  { %v356_v9 = vpack.c.bf16 %v355_v8, %v354_v7 }
 0x382   :  { %v1221_v10 = vpop.eup %1220 }
 0x383   :  { %v1223_v11 = vpop.eup %1222  ;;  %1096 = vmatmul.mubr.msk.bf16.vlgmr.msra.gmra.mxu0 %vm212_vm9, %v356_v9  ;;  %v476_v15 = vmul.f32 %v1221_v10, %v1207_v45 }
 0x384   :  { %1106 = vmatpush3.bf16.msra.mxu0 %v479_v12  ;;  %1107 = vmatprep.mubr.msk.bf16.mxu0 %vm1263_vm0, %v1262_v1  ;;  %v475_v14 = vmul.f32 %v1223_v11, %v1205_v43 }
 0x385   :  { %1117 = vmatprep.subr.bf16.mxu0 %v1262_v1 }
 0x386   :  { %v1225_v16 = vpop.eup %1224  ;;  %v477_v17 = vpack.c.bf16 %v476_v15, %v475_v14 }
 0x387   :  { %v1227_v18 = vpop.eup %1226  ;;  %v597_v21 = vmul.f32 %v1225_v16, %v1211_v49 }
 0x388   :  { %v596_v20 = vmul.f32 %v1227_v18, %v1414_v46 }
 0x38a   :  { %v598_v22 = vpack.c.bf16 %v597_v21, %v596_v20 }
 0x38b   :  { %1108 = vmatmul.mubr.msk.bf16.vlgmr.msra.gmra.mxu0 %vm212_vm9, %v477_v17 }
 0x38c   :  { %1118 = vmatpush3.bf16.msra.mxu0 %v600_v19  ;;  %1119 = vmatprep.mubr.msk.bf16.mxu0 %vm1263_vm0, %v1262_v1  ;;  %v1191_v19 = vld [vmem:[%s1523_s6] sm:$0xff]  }
 0x38d   :  { %1131 = vmatprep.subr.bf16.mxu0 %v1262_v1 }
 0x393   :  { %1120 = vmatmul.mubr.msk.bf16.vlgmr.msra.gmra.mxu0 %vm212_vm9, %v598_v22 }
 0x394   :  { %1135 = vmatprep.mubr.msk.bf16.mxu0 %vm1263_vm0, %v1262_v1 }
 0x40e   :  { %v276_v23 = vpop.f32.mrf.mxu0 }
 0x410   :  { %v1085_v24 = vpop.f32.mrf.mxu0 }
 0x412   :  { %v279_v25 = vpop.f32.mrf.mxu0 }
 0x414   :  { %v1086_v26 = vpop.f32.mrf.mxu0 }
 0x443   :  { %v397_v27 = vpop.f32.mrf.mxu0 }
 0x445   :  { %v1097_v28 = vpop.f32.mrf.mxu0 }
 0x446   :  { %v1023_v28 = vld [vmem:[%s1522_s5 + $0x1] ss:$0 sm:$0xff] }
 0x447   :  { %v400_v29 = vpop.f32.mrf.mxu0 }
 0x448   :  { %v1171_v31 = vpack.i.bf16 %v400_v29, %v397_v27 }
 0x449   :  { %v1098_v32 = vpop.f32.mrf.mxu0 }
 0x44a   :  { %1172 = vrot.lane.b32.xlu1 %v1171_v31, %s1277_s30  ;;  %v1024_v32 = vld [vmem:[%s1522_s5 + $0x2] ss:$0 sm:$0xff] }
 0x44b   :  { %v518_v33 = vpop.f32.mrf.mxu0 }
 0x44d   :  { %v1109_v34 = vpop.f32.mrf.mxu0 }
 0x44f   :  { %v521_v36 = vpop.f32.mrf.mxu0 }
 0x450   :  { %v1176_v37 = vpack.i.bf16 %v521_v36, %v518_v33 }
 0x451   :  { %v1110_v38 = vpop.f32.mrf.mxu0 }
 0x452   :  { %1177 = vrot.lane.b32.xlu0 %v1176_v37, %s1278_s12  ;;  %v1192_v37 = vld [vmem:[%s1525_s8 + $0x18] sm:$0xff]   ;;  %v1193_v38 = vld [vmem:[%s1525_s8 + $0x10] sm:$0xff]   ;;  %s1280_s12 = smov [#allocation2]  }
 0x453   :  { %v639_v39 = vpop.f32.mrf.mxu0 }
 0x455   :  { %v1121_v40 = vpop.f32.mrf.mxu0 }
 0x456   :  { %v1195_v40 = vld [vmem:[%s1525_s8] sm:$0xff]  }
 0x457   :  { %v642_v41 = vpop.f32.mrf.mxu0 }
 0x458   :  { %v1181_v42 = vpack.i.bf16 %v642_v41, %v639_v39  ;;  %v1194_v39 = vld [vmem:[%s1525_s8 + $0x8] sm:$0xff]   ;;  %v1025_v41 = vld [vmem:[%s1524_s7] ss:$0 sm:$0xff] }
 0x459   :  { %v1122_v43 = vpop.f32.mrf.mxu0 }
 0x45a   :  { %1182 = vrot.lane.b32.xlu1 %v1181_v42, %s1279_s13  ;;  %s996_s13 = sshll.u32 %s1280_s12, 4  ;;  %s997_s13 = int_to_ptr.vmem [resolvable:$true] %s996_s13 }
 0x45b   :  { %s1240_s4 = scalar_lea.vmem %s997_s13, 256  ;;  %p1245_p1 = scmp.lt.s32.totalorder %s997_s13, %s997_s13 }
 0x45c   :  { %p1241_p0 = scmp.ne.s32.totalorder %s997_s13, %s1240_s4  ;;  %p1246_p2 = scmp.lt.s32.totalorder %s1240_s4, %s1240_s4 }
 0x45e   :  { %p1247_p3 = por %p1246_p2, %p1245_p1 }
 0x460   :  { %p1248_p4 = pnand %p1247_p3, %p1241_p0 }
 0x4bc   :  { %v1173_v44 = vpop.permute.xlu1 %1172 }
 0x4bd   :  { %v1175_v46 = vunpack.i.h.bf16 %v1173_v44  ;;  %v1174_v47 = vunpack.i.l.bf16 %v1173_v44 }
 0x4bf   :  { %v671_v51 = vsel %vm164_vm2, %v279_v25, %v1175_v46  ;;  %v670_v52 = vsel %vm164_vm2, %v276_v23, %v1174_v47 }
 0x4c4   :  { %v1178_v45 = vpop.permute.xlu0 %1177 }
 0x4c5   :  { %v1180_v48 = vunpack.i.h.bf16 %v1178_v45  ;;  %v1179_v49 = vunpack.i.l.bf16 %v1178_v45 }
 0x4c7   :  { %v673_v55 = vsel %vm212_vm9, %v671_v51, %v1180_v48  ;;  %v672_v56 = vsel %vm212_vm9, %v670_v52, %v1179_v49 }
 0x4cc   :  { %v1183_v50 = vpop.permute.xlu1 %1182 }
 0x4cd   :  { %v1185_v53 = vunpack.i.h.bf16 %v1183_v50  ;;  %v1184_v54 = vunpack.i.l.bf16 %v1183_v50 }
 0x4cf   :  { %v676_v57 = vsel %vm674_vm10, %v673_v55, %v1185_v53  ;;  %v675_v58 = vsel %vm674_vm10, %v672_v56, %v1184_v54 }
 0x4d0   :  { %v677_v59 = vpack.c.bf16 %v676_v57, %v675_v58  ;;  %v1029_v58 = vld [vmem:[%s1522_s5 + $0x3] ss:$0 sm:$0xff] }
 0x4d2   :  { %1128 = vmatmul.mubr.msk.bf16.vlgmr.msra.gmra.mxu1 %vm60_vm1, %v677_v59 }
 0x4d3   :  { %1147 = vmatprep.mubr.msk.bf16.mxu1 %vm1263_vm0, %v1262_v1  ;;  %1140 = vmatpush3.bf16.msra.mxu1 %v1192_v37 }
 0x4d4   :  { %1141 = vmatprep.subr.bf16.mxu1 %v1262_v1 }
 0x4d7   :  { %1142 = vmatpush3.bf16.msra.mxu1 %v1193_v38 }
 0x4d8   :  { %1143 = vmatprep.subr.bf16.mxu1 %v1262_v1 }
 0x4db   :  { %1144 = vmatpush3.bf16.msra.mxu1 %v1194_v39 }
 0x4dc   :  { %1145 = vmatprep.subr.bf16.mxu1 %v1262_v1 }
 0x4df   :  { %1146 = vmatpush3.bf16.msra.mxu1 %v1195_v40 }
 0x592   :  { %v736_v61 = vpop.f32.mrf.mxu1 }
 0x593   :  { %v737_v13 = vadd.f32 %v1019_v60, %v736_v61 }
 0x594   :  { %v1129_v62 = vpop.f32.mrf.mxu1 }
 0x595   :  { %v743_v63 = vadd.f32 %v737_v13, %v1345_v3 }
 0x596   :  { %v739_v0 = vpop.f32.mrf.mxu1 }
 0x597   :  { %v740_v2 = vadd.f32 %v1019_v60, %v739_v0  ;;  %v747_v5 = vsel %vm60_vm1, %v743_v63, 0.0 }
 0x598   :  { %748 = vadd.xlane.f32.xlu0 %v747_v5  ;;  %v1130_v6 = vpop.f32.mrf.mxu1 }
 0x599   :  { %v744_v7 = vadd.f32 %v740_v2, %v1350_v4  ;;  %v1190_v4 = vld [vmem:[%s1523_s6 + $0x8] sm:$0xff]  }
 0x59a   :  { %1132 = vmatpush3.bf16.msra.mxu0 %v1190_v4 }
 0x59b   :  { %v750_v8 = vsel %vm60_vm1, %v744_v7, 0.0  ;;  %1133 = vmatprep.subr.bf16.mxu0 %v1262_v1 }
 0x59c   :  { %751 = vadd.xlane.f32.xlu1 %v750_v8 }
 0x59e   :  { %1134 = vmatpush3.bf16.msra.mxu0 %v1191_v19 }
 0x621   :  { %v749_v9 = vpop.xlane.xlu0 %748 }
 0x622   :  { %v754_v10 = vmul.f32 0.03125, %v749_v9 }
 0x624   :  { %v756_v11 = vsub.f32 %v743_v63, %v754_v10 }
 0x625   :  { %v752_v12 = vpop.xlane.xlu1 %751 }
 0x626   :  { %v755_v14 = vmul.f32 0.03125, %v752_v12  ;;  %v758_v15 = vmul.f32 %v756_v11, %v756_v11 }
 0x628   :  { %v757_v16 = vsub.f32 %v744_v7, %v755_v14  ;;  %v760_v3 = vsel %vm60_vm1, %v758_v15, 0.0 }
 0x629   :  { %761 = vadd.xlane.f32.xlu0 %v760_v3 }
 0x62a   :  { %v759_v17 = vmul.f32 %v757_v16, %v757_v16 }
 0x62c   :  { %v763_v18 = vsel %vm60_vm1, %v759_v17, 0.0 }
 0x62d   :  { %764 = vadd.xlane.f32.xlu0 %v763_v18 }
 0x6b2   :  { %v762_v20 = vpop.xlane.xlu0 %761 }
 0x6b3   :  { %v766_v21 = vmul.f32 0.03125, %v762_v20 }
 0x6b5   :  { %v768_v22 = vadd.f32 1e-05, %v766_v21 }
 0x6b6   :  { %v765_v23 = vpop.xlane.xlu0 %764 }
 0x6b7   :  { %1228 = vrsqrt.f32 %v768_v22  ;;  %v767_v24 = vmul.f32 0.03125, %v765_v23  ;;  %v1035_v23 = vld [vmem:[%s1522_s5 + $0x4] ss:$0 sm:$0xff] }
 0x6b9   :  { %v769_v25 = vadd.f32 1e-05, %v767_v24 }
 0x6bb   :  { %1230 = vrsqrt.f32 %v769_v25  ;;  %v1036_v25 = vld [vmem:[%s1522_s5 + $0x5] ss:$0 sm:$0xff] }
 0x6c4   :  { %v1229_v26 = vpop.eup %1228 }
 0x6c5   :  { %v772_v27 = vmul.f32 %v1229_v26, %v756_v11 }
 0x6c7   :  { %v778_v31 = vmul.f32 %v1023_v28, %v772_v27 }
 0x6c8   :  { %v1231_v29 = vpop.eup %1230 }
 0x6c9   :  { %v773_v30 = vmul.f32 %v1231_v29, %v757_v16  ;;  %v784_v34 = vadd.f32 %v1024_v32, %v778_v31 }
 0x6cb   :  { %v779_v33 = vmul.f32 %v1023_v28, %v773_v30 }
 0x6cd   :  { %v785_v35 = vadd.f32 %v1024_v32, %v779_v33 }
 0x6cf   :  { %v786_v36 = vpack.c.bf16 %v785_v35, %v784_v34 }
 0x6d1   :  { %1136 = vmatmul.mubr.msk.bf16.vlgmr.msra.gmra.mxu0 %vm60_vm1, %v786_v36 }
 0x791   :  { %v847_v42 = vpop.f32.mrf.mxu0 }
 0x792   :  { %v848_v43 = vadd.f32 %v1025_v41, %v847_v42 }
 0x793   :  { %v1137_v44 = vpop.f32.mrf.mxu0 }
 0x794   :  { %v856_v45 = vmul.f32 0.70710677, %v848_v43  ;;  %v854_v52 = vmul.f32 0.5, %v848_v43 }
 0x795   :  { %v850_v46 = vpop.f32.mrf.mxu0 }
 0x796   :  { %1232 = verf.f32 %v856_v45  ;;  %v851_v47 = vadd.f32 %v1025_v41, %v850_v46 }
 0x797   :  { %v1138_v48 = vpop.f32.mrf.mxu0 }
 0x798   :  { %v857_v49 = vmul.f32 0.70710677, %v851_v47  ;;  %v855_v53 = vmul.f32 0.5, %v851_v47 }
 0x79a   :  { %1234 = verf.f32 %v857_v49 }
 0x7a3   :  { %v1233_v1 = vpop.eup %1232 }
 0x7a4   :  { %v860_v50 = vadd.f32 1.0, %v1233_v1 }
 0x7a6   :  { %v862_v55 = vmul.f32 %v860_v50, %v854_v52 }
 0x7a7   :  { %v1235_v51 = vpop.eup %1234 }
 0x7a8   :  { %v861_v54 = vadd.f32 1.0, %v1235_v51 }
 0x7aa   :  { %v863_v56 = vmul.f32 %v861_v54, %v855_v53 }
 0x7ac   :  { %v864_v57 = vpack.c.bf16 %v863_v56, %v862_v55 }
 0x7ae   :  { %1148 = vmatmul.mubr.msk.bf16.vlgmr.msra.gmra.mxu1 %vm902_vm11, %v864_v57 }
 0x86e   :  { %v940_v59 = vpop.f32.mrf.mxu1 }
 0x86f   :  { %v941_v60 = vadd.f32 %v1029_v58, %v940_v59 }
 0x870   :  { %v1149_v61 = vpop.f32.mrf.mxu1 }
 0x871   :  { %v947_v13 = vadd.f32 %v941_v60, %v784_v34 }
 0x872   :  { %v943_v62 = vpop.f32.mrf.mxu1 }
 0x873   :  { %v944_v63 = vadd.f32 %v1029_v58, %v943_v62  ;;  %v951_v0 = vsel %vm60_vm1, %v947_v13, 0.0 }
 0x874   :  { %952 = vadd.xlane.f32.xlu1 %v951_v0  ;;  %v1150_v2 = vpop.f32.mrf.mxu1 }
 0x875   :  { %v948_v5 = vadd.f32 %v944_v63, %v785_v35 }
 0x877   :  { %v954_v6 = vsel %vm60_vm1, %v948_v5, 0.0 }
 0x878   :  { %955 = vadd.xlane.f32.xlu0 %v954_v6 }
 0x8fd   :  { %v953_v7 = vpop.xlane.xlu1 %952 }
 0x8fe   :  { %v957_v8 = vmul.f32 0.03125, %v953_v7 }
 0x900   :  { %v959_v9 = vsub.f32 %v947_v13, %v957_v8 }
 0x901   :  { %v956_v10 = vpop.xlane.xlu0 %955 }
 0x902   :  { %v958_v11 = vmul.f32 0.03125, %v956_v10  ;;  %v961_v12 = vmul.f32 %v959_v9, %v959_v9 }
 0x904   :  { %v960_v14 = vsub.f32 %v948_v5, %v958_v11  ;;  %v963_v15 = vsel %vm60_vm1, %v961_v12, 0.0 }
 0x905   :  { %964 = vadd.xlane.f32.xlu1 %v963_v15 }
 0x906   :  { %v962_v16 = vmul.f32 %v960_v14, %v960_v14 }
 0x908   :  { %v966_v3 = vsel %vm60_vm1, %v962_v16, 0.0 }
 0x909   :  { %967 = vadd.xlane.f32.xlu0 %v966_v3 }
 0x98e   :  { %v965_v17 = vpop.xlane.xlu1 %964 }
 0x98f   :  { %v969_v18 = vmul.f32 0.03125, %v965_v17 }
 0x991   :  { %v971_v4 = vadd.f32 1e-05, %v969_v18 }
 0x992   :  { %v968_v19 = vpop.xlane.xlu0 %967 }
 0x993   :  { %1236 = vrsqrt.f32 %v971_v4  ;;  %v970_v20 = vmul.f32 0.03125, %v968_v19 }
 0x995   :  { %v972_v21 = vadd.f32 1e-05, %v970_v20 }
 0x997   :  { %1238 = vrsqrt.f32 %v972_v21 }
 0x9a0   :  { %v1237_v22 = vpop.eup %1236 }
 0x9a1   :  { %v975_v24 = vmul.f32 %v1237_v22, %v959_v9 }
 0x9a3   :  { %v981_v26 = vmul.f32 %v1035_v23, %v975_v24 }
 0x9a4   :  { %v1239_v27 = vpop.eup %1238 }
 0x9a5   :  { %v976_v28 = vmul.f32 %v1239_v27, %v960_v14  ;;  %v987_v29 = vadd.f32 %v1036_v25, %v981_v26 }
 0x9a7   :  { %v982_v30 = vmul.f32 %v1035_v23, %v976_v28  ;;  %989 = vst.msk [vmem:[#allocation2] sm:$0xff] %vm60_vm1, %v987_v29 }
 0x9a9   :  { %v988_v31 = vadd.f32 %v1036_v25, %v982_v30 }
 0x9ab   :  { %990 = vst.msk [vmem:[#allocation2 + $0x8] sm:$0xff] %vm60_vm1, %v988_v31 }
 0x9ac   :  { %1251 = shalt.err (!%p1248_p4)
}
 0x9ad   :  { %s1281_s5 = smov 128  }
 0x9ae   :  { %1002 = dma.vmem_to_hbm [thread:$0]  %s997_s13, 256, %s1526_s9, [#allocation3], %s1281_s5, %s1281_s5, %s1277_s30  }
 0x9af   :  { %1260 = dma.done.wait [#allocation3], 256  }
 0x9b0   :  { %1261 = vsyncadd [#allocation3], 4294967040 }
 0x9b1   :  { %1006 = vsyncpa [#allocation3], 1 }

</bundles_post_ra>
